<compile_context>
chip_gen: v7x
topology: tpu7x:2x2x1
jax: 0.10.0
libtpu: 0.0.40
codegen_flags: <defaults>
</compile_context>

<pallas_src>
import functools

import numpy as np

import jax
import jax.numpy as jnp
from jax import lax
from jax.experimental import pallas as pl
from jax.experimental.pallas import tpu as pltpu


_NUM_SLABS = 2             # leading "parallel" grid axis: both v7x TensorCores
_FLAT = 128                # lane-dense flat confusion size for the small-K path
_MAX_TILE = 8192           # sample-tile cap (multiple of 128)
_EXACT_SAMPLE_LIMIT = 1 << 24   # keep every f32 count cell below 2^24 -> exact


def _round_up(x, m):
    return ((x + m - 1) // m) * m


@functools.lru_cache(maxsize=1)
def _vmem_budget():
    """(vmem_limit_bytes, tiling budget bytes) per TPU generation."""
    kind = ""
    try:
        kind = jax.devices()[0].device_kind.lower()
    except Exception:
        pass
    if ("v5" in kind) or ("v6" in kind):
        limit = 64 * 1024 * 1024        # v5e/v6e: 128 MiB physical VMEM
    else:
        limit = 32 * 1024 * 1024        # v7x: 64 MiB/core (and unknown chips)
    return limit, limit - 4 * 1024 * 1024


def _pick_tile_n(n, per_sample_bytes, fixed_bytes, budget_bytes):
    tile = (budget_bytes - fixed_bytes) // max(per_sample_bytes, 1)
    tile = int(max(128, min(_MAX_TILE, (tile // 128) * 128)))
    # tile_n is always a multiple of 128 so the (1, tile_n) labels block and the
    # (tile_n, C) logits block satisfy the (8, 128) BlockSpec constraint.
    return min(tile, _round_up(n, 128))


# ----------------------------------------------------------------------------
# General path: sample-major logits [N, C], conf += onehot_t^T-style MXU dot.
# ----------------------------------------------------------------------------
def _general_kernel_factory(n_rows, tile_n, steps_per_core, kp):
    def kernel(logits_ref, labels_ref, conf_ref):
        step = pl.program_id(1)

        @pl.when(step == 0)
        def _init():
            conf_ref[...] = jnp.zeros_like(conf_ref)

        x = logits_ref[...]                       # [TN, C] native dtype (no upcast)
        tn, c = x.shape
        lab = labels_ref[...]                     # [1, TN] int32, lane-major

        # argmax over the class (lane) axis, first-max tie-break (torch.max).
        col = lax.broadcasted_iota(jnp.int32, (1, c), 1)
        mx = jnp.max(x, axis=1, keepdims=True)
        preds = jnp.min(jnp.where(x >= mx, col, c), axis=1, keepdims=True)  # [TN,1]

        # Fold the row-validity mask into the label: padded / out-of-range rows
        # get label kp, which matches no class -> all-zero one-hot column, so
        # garbage/NaN logits in padded rows contribute nothing.
        blk = pl.program_id(0) * steps_per_core + step          # unclamped
        pos = blk * tile_n + lax.broadcasted_iota(jnp.int32, (1, tn), 1)
        lab = jnp.where(pos < n_rows, lab, kp)

        oh_t = (lab == lax.broadcasted_iota(jnp.int32, (kp, 1), 0)
                ).astype(jnp.bfloat16)            # [KP, TN]
        oh_p = (preds == lax.broadcasted_iota(jnp.int32, (1, kp), 1)
                ).astype(jnp.bfloat16)            # [TN, KP]

        # conf[t, p] += sum_n oh_t[t, n] * oh_p[n, p]: canonical MXU form
        # (LHS contracts on lanes, RHS on sublanes), exact f32 accumulation
        # into the resident [KP, KP] slab.
        conf_ref[...] += lax.dot_general(
            oh_t, oh_p, (((1,), (0,)), ((), ())),
            preferred_element_type=jnp.float32)

    return kernel


@functools.lru_cache(maxsize=None)
def _build_general_call(n, c, k, dtype_name):
    itemsize = jnp.dtype(dtype_name).itemsize
    kp = _round_up(max(k, c, 2), 128)
    vmem_limit, budget = _vmem_budget()

    # VMEM budget accounts for the lane-padded logits/labels blocks AND the
    # in-kernel [TN, KP]-sized intermediates, not just the logits bytes.
    c_pad = _round_up(c, 128)
    per_sample = (2 * c_pad * itemsize        # double-buffered logits block
                  + 2 * 8 * 4                 # double-buffered (1, TN) labels block
                  + 3 * c_pad * 4             # argmax temporaries
                  + 6 * kp)                   # bf16 one-hots + compare slack
    fixed = 2 * kp * kp * 4 + (2 << 20)       # resident accumulator + headroom
    tile_n = _pick_tile_n(n, per_sample, fixed, budget)

    nb = pl.cdiv(n, tile_n)
    spc = pl.cdiv(nb, _NUM_SLABS)

    def sample_block(ci, s):
        # Clamp so the edge core never DMAs out of range; those steps are
        # fully masked in-kernel via the unclamped position check.
        return jnp.minimum(ci * spc + s, nb - 1)

    call = pl.pallas_call(
        _general_kernel_factory(n, tile_n, spc, kp),
        out_shape=jax.ShapeDtypeStruct((_NUM_SLABS * kp, kp), jnp.float32),
        grid_spec=pltpu.PrefetchScalarGridSpec(
            num_scalar_prefetch=0,
            grid=(_NUM_SLABS, spc),
            in_specs=[
                pl.BlockSpec((tile_n, c), lambda ci, s: (sample_block(ci, s), 0)),
                pl.BlockSpec((1, tile_n), lambda ci, s: (0, sample_block(ci, s))),
            ],
            out_specs=pl.BlockSpec((kp, kp), lambda ci, s: (ci, 0)),
        ),
        compiler_params=pltpu.CompilerParams(
            dimension_semantics=("parallel", "arbitrary"),
            vmem_limit_bytes=vmem_limit),
        cost_estimate=pl.CostEstimate(
            flops=int(2 * _NUM_SLABS * spc * tile_n * kp * kp),
            transcendentals=0,
            bytes_accessed=int(n * c * itemsize + n * 4
                               + _NUM_SLABS * kp * kp * 4)),
    )

    @jax.jit
    def run(logits, labels):
        out = call(logits, labels.reshape(1, -1).astype(jnp.int32))
        conf = out.reshape(_NUM_SLABS, kp, kp).sum(axis=0)
        return conf[:k, :k]

    return run


# ----------------------------------------------------------------------------
# Small-K path (k*k <= 128): class-major logits [C, N], combined-index one-hot.
# ----------------------------------------------------------------------------
def _small_k_kernel_factory(n_rows, tile_n, steps_per_core, k):
    def kernel(logits_ref, labels_ref, conf_ref):
        step = pl.program_id(1)

        @pl.when(step == 0)
        def _init():
            conf_ref[...] = jnp.zeros_like(conf_ref)

        x = logits_ref[...]                       # [C, TN] class-major
        c, tn = x.shape
        lab = labels_ref[...]                     # [1, TN] int32

        # argmax over the class (sublane) axis, first-max tie-break.
        row = lax.broadcasted_iota(jnp.int32, (c, 1), 0)
        mx = jnp.max(x, axis=0, keepdims=True)
        preds = jnp.min(jnp.where(x >= mx, row, c), axis=0, keepdims=True)  # [1,TN]

        # Combined index label*k + pred; padded rows (and the degenerate
        # all-NaN pred == c == k case) map to _FLAT, which matches no bucket.
        blk = pl.program_id(0) * steps_per_core + step
        pos = blk * tile_n + lax.broadcasted_iota(jnp.int32, (1, tn), 1)
        comb = jnp.where((pos < n_rows) & (preds < k), lab * k + preds, _FLAT)

        oh = (comb == lax.broadcasted_iota(jnp.int32, (_FLAT, 1), 0)
              ).astype(jnp.bfloat16)              # [128, TN] single one-hot
        ones = jnp.ones((tn, 1), jnp.bfloat16)
        conf_ref[...] += lax.dot_general(         # [128, 1] counts via MXU matvec
            oh, ones, (((1,), (0,)), ((), ())),
            preferred_element_type=jnp.float32)

    return kernel


@functools.lru_cache(maxsize=None)
def _build_small_k_call(n, c, k, dtype_name):
    itemsize = jnp.dtype(dtype_name).itemsize
    vmem_limit, budget = _vmem_budget()

    c_sub = _round_up(c, 8)
    per_sample = (2 * c_sub * itemsize        # double-buffered class-major logits
                  + 2 * 8 * 4                 # double-buffered labels
                  + 2 * c_sub * 4             # argmax temporaries
                  + 3 * _FLAT)                # bf16 one-hot + slack
    fixed = 2 * _FLAT * 4 + (2 << 20)
    tile_n = _pick_tile_n(n, per_sample, fixed, budget)

    nb = pl.cdiv(n, tile_n)
    spc = pl.cdiv(nb, _NUM_SLABS)

    def sample_block(ci, s):
        return jnp.minimum(ci * spc + s, nb - 1)

    call = pl.pallas_call(
        _small_k_kernel_factory(n, tile_n, spc, k),
        out_shape=jax.ShapeDtypeStruct((_NUM_SLABS * _FLAT, 1), jnp.float32),
        grid_spec=pltpu.PrefetchScalarGridSpec(
            num_scalar_prefetch=0,
            grid=(_NUM_SLABS, spc),
            in_specs=[
                pl.BlockSpec((c, tile_n), lambda ci, s: (0, sample_block(ci, s))),
                pl.BlockSpec((1, tile_n), lambda ci, s: (0, sample_block(ci, s))),
            ],
            out_specs=pl.BlockSpec((_FLAT, 1), lambda ci, s: (ci, 0)),
        ),
        compiler_params=pltpu.CompilerParams(
            dimension_semantics=("parallel", "arbitrary"),
            vmem_limit_bytes=vmem_limit),
        cost_estimate=pl.CostEstimate(
            flops=int(2 * _NUM_SLABS * spc * tile_n * _FLAT),
            transcendentals=0,
            bytes_accessed=int(n * c * itemsize + n * 4 + _NUM_SLABS * _FLAT * 4)),
    )

    @jax.jit
    def run(logits_cm, labels):
        out = call(logits_cm, labels.reshape(1, -1).astype(jnp.int32))
        flat = out.reshape(_NUM_SLABS, _FLAT).sum(axis=0)
        return flat[:k * k].reshape(k, k)

    return run


# ----------------------------------------------------------------------------
# Host wrappers: chunk > 2^24 samples so f32 counts stay exact, sum in int64.
# ----------------------------------------------------------------------------
def _confusion_matrix_general(logits, labels, k):
    """logits: [N, C] sample-major -> [k, k] int64 confusion counts."""
    n, c = int(logits.shape[0]), int(logits.shape[1])
    conf = np.zeros((k, k), dtype=np.int64)
    for start in range(0, n, _EXACT_SAMPLE_LIMIT):
        stop = min(start + _EXACT_SAMPLE_LIMIT, n)
        whole = (start == 0 and stop == n)
        lg = logits if whole else logits[start:stop]
        lb = labels if whole else labels[start:stop]
        run = _build_general_call(stop - start, c, k, str(logits.dtype))
        part = jax.block_until_ready(run(lg, lb))
        conf += np.rint(np.asarray(part)).astype(np.int64)
    return conf


def _confusion_matrix_small_k(logits_cm, labels, k):
    """logits_cm: [C, N] class-major, k*k <= 128 -> [k, k] int64 counts."""
    c, n = int(logits_cm.shape[0]), int(logits_cm.shape[1])
    conf = np.zeros((k, k), dtype=np.int64)
    for start in range(0, n, _EXACT_SAMPLE_LIMIT):
        stop = min(start + _EXACT_SAMPLE_LIMIT, n)
        whole = (start == 0 and stop == n)
        lg = logits_cm if whole else logits_cm[:, start:stop]
        lb = labels if whole else labels[start:stop]
        run = _build_small_k_call(stop - start, c, k, str(logits_cm.dtype))
        part = jax.block_until_ready(run(lg, lb))
        conf += np.rint(np.asarray(part)).astype(np.int64)
    return conf


# ----------------------------------------------------------------------------
# Module mirror.
# ----------------------------------------------------------------------------
class MetricsBuilder:
    """JAX mirror of the abstract PyTorch MetricsBuilder base class."""

    # TODO(synk): mirrors Config.global_dict['train'][name] = cls behaviour.
    _registry = {"train": {}}

    def __init__(self, *args, **kwargs):
        pass  # no parameters, matching the PyTorch __init__

    def __init_subclass__(cls, **kwargs):
        super().__init_subclass__(**kwargs)
        MetricsBuilder._registry["train"][str(cls.__name__)] = cls

    def forward(self, *args):
        raise NotImplementedError

    def __call__(self, *args):
        return self.forward(*args)


class ClassificationMetrics(MetricsBuilder):
    def __init__(self, *args, verbose=False, **kwargs):
        super().__init__()
        self.verbose = verbose  # prints suppressed by default to keep stdout clean

    def forward(self, epoch_loss, outputs, labels, phase, config, idx):
        outputs = jnp.asarray(outputs)
        labels = jnp.asarray(labels)
        k = max(int(config.args.target_shape_list[idx]), 2)
        n = int(labels.shape[0])

        if outputs.ndim == 1:
            # round(sigmoid(x)) == argmax over class-major logits [[0],[x]] with
            # first-max tie-break (x == 0 -> class 0, matching torch.round(0.5)==0).
            logits_cm = jnp.stack([jnp.zeros_like(outputs), outputs], axis=0)
            if k * k <= _FLAT:
                conf_mat = _confusion_matrix_small_k(logits_cm, labels, k)
            else:
                conf_mat = _confusion_matrix_general(logits_cm.T, labels, k)
        else:
            # argmax(log_softmax(x, 1), 1) == argmax(x, 1): softmax folded away.
            c = int(outputs.shape[1])
            if k * k <= _FLAT and c <= k:
                # Class-major layout: lane-dense sample axis (wide DMAs for small
                # C) + a single combined one-hot inside the kernel.
                conf_mat = _confusion_matrix_small_k(outputs.T, labels, k)
            else:
                conf_mat = _confusion_matrix_general(outputs, labels, k)

        # Host-side O(K^2) derivations (mirrors the sklearn / torch CPU code).
        diag = np.diag(conf_mat).astype(np.float64)
        rowsum = conf_mat.sum(axis=1).astype(np.float64)
        colsum = conf_mat.sum(axis=0).astype(np.float64)

        epoch_acc = float(diag.sum() / n)                        # accuracy_score
        present = (rowsum + colsum) > 0                          # sklearn macro-F1 label set
        f1_per_class = np.where(present,
                                2.0 * diag / np.maximum(rowsum + colsum, 1.0),
                                0.0)
        epoch_f1 = float(f1_per_class.sum() / max(int(present.sum()), 1))

        with np.errstate(divide="ignore", invalid="ignore"):
            class_acc = (diag / rowsum).astype(np.float32)       # NaN for empty classes

        if self.verbose:
            print('{} Loss {}: {:.4f} Acc: {:.4f} F1 Score: {:.4f}'.format(
                phase, idx, epoch_loss, epoch_acc, epoch_f1))
            print('Confusion matrix (row=target, column=preds):')
            print(conf_mat)
            print('Class accuracy:')
            print(class_acc)
            print()

        return {'loss': epoch_loss, 'acc': epoch_acc, 'f1': epoch_f1,
                'class_acc': class_acc, 'conf_mat': conf_mat,
                'checkpointer': epoch_f1}


def _reference_metrics(outputs, labels, k):
    """Pure-numpy reference mirroring the PyTorch/sklearn computation."""
    o = np.asarray(outputs, dtype=np.float64)
    l = np.asarray(labels)
    if o.ndim == 1:
        preds = (o > 0).astype(np.int64)          # round(sigmoid(x))
    else:
        preds = o.argmax(axis=1)
    conf = np.zeros((k, k), dtype=np.int64)
    for t, p in zip(l, preds):
        conf[int(t), int(p)] += 1
    acc = float((l == preds).mean())
    rowsum = conf.sum(1).astype(np.float64)
    colsum = conf.sum(0).astype(np.float64)
    diag = np.diag(conf).astype(np.float64)
    present = (rowsum + colsum) > 0
    f1 = np.where(present, 2.0 * diag / np.maximum(rowsum + colsum, 1.0), 0.0)
    macro_f1 = float(f1.sum() / max(int(present.sum()), 1))
    return conf, acc, macro_f1


if __name__ == "__main__":
    key = jax.random.PRNGKey(0)
    k1, k2, k3, k4, k5, k6 = jax.random.split(key, 6)

    class _Args:
        target_shape_list = [4, 1, 40]

    class _Config:
        args = _Args()

    config = _Config()

    # Abstract-base contract is preserved.
    try:
        MetricsBuilder()(None)
        raise AssertionError("MetricsBuilder.forward must raise NotImplementedError")
    except NotImplementedError:
        pass
    assert "ClassificationMetrics" in MetricsBuilder._registry["train"]

    metrics = ClassificationMetrics()

    # 1) Multiclass, small K (routes to the combined-index / class-major kernel).
    N, C = 64, 4
    outputs = jax.random.normal(k1, (N, C), dtype=jnp.float32)
    labels = jax.random.randint(k2, (N,), 0, C, dtype=jnp.int32)
    out = metrics(0.1234, outputs, labels, "val", config, 0)
    ref_conf, ref_acc, ref_f1 = _reference_metrics(outputs, labels, 4)
    assert np.array_equal(out["conf_mat"], ref_conf)
    assert abs(out["acc"] - ref_acc) < 1e-6
    assert abs(out["f1"] - ref_f1) < 1e-6
    assert out["checkpointer"] == out["f1"]
    assert out["class_acc"].shape == (4,)

    # 2) Binary (1-D outputs, sigmoid+round); target_shape_list[1]=1 -> 2x2 matrix.
    outputs1 = jax.random.normal(k3, (N,), dtype=jnp.float32)
    labels1 = jax.random.randint(k4, (N,), 0, 2, dtype=jnp.int32)
    out1 = metrics(0.5678, outputs1, labels1, "train", config, 1)
    ref_conf1, ref_acc1, ref_f11 = _reference_metrics(outputs1, labels1, 2)
    assert np.array_equal(out1["conf_mat"], ref_conf1)
    assert abs(out1["acc"] - ref_acc1) < 1e-6
    assert abs(out1["f1"] - ref_f11) < 1e-6

    # 3) Larger K (routes to the general onehot^T @ onehot MXU kernel).
    N3, C3 = 96, 40
    outputs3 = jax.random.normal(k5, (N3, C3), dtype=jnp.float32)
    labels3 = jax.random.randint(k6, (N3,), 0, C3, dtype=jnp.int32)
    out3 = metrics(0.9, outputs3, labels3, "val", config, 2)
    ref_conf3, ref_acc3, ref_f13 = _reference_metrics(outputs3, labels3, 40)
    assert np.array_equal(out3["conf_mat"], ref_conf3)
    assert abs(out3["acc"] - ref_acc3) < 1e-6
    assert abs(out3["f1"] - ref_f13) < 1e-6

    print("KERNEL_OK")
</pallas_src>

<mosaic_0001>
module attributes {stable_mosaic.version = 11 : i64} {
  func.func @kernel(%arg0: i32, %arg1: i32, %arg2: memref<4x128xf32, #tpu.memory_space<vmem>>, %arg3: memref<1x128xi32, #tpu.memory_space<vmem>>, %arg4: memref<128x1xf32, #tpu.memory_space<vmem>>) attributes {dimension_semantics = [#tpu.dimension_semantics<parallel>, #tpu.dimension_semantics<arbitrary>], iteration_bounds = array<i64: 2, 1>, scalar_prefetch = 0 : i64, scratch_operands = 0 : i64, tpu.core_type = #tpu.core_type<tc>, window_params = [{transform_indices = @transform_0, window_bounds = array<i64: 4, 128>}, {transform_indices = @transform_1, window_bounds = array<i64: 1, 128>}, {transform_indices = @transform_2, window_bounds = array<i64: 128, 1>}]} {
    %c0_i32 = arith.constant 0 : i32
    %0 = arith.cmpi eq, %arg1, %c0_i32 : i32
    %1 = arith.extui %0 : i1 to i32
    %c0_i32_0 = arith.constant 0 : i32
    %2 = arith.cmpi ne, %1, %c0_i32_0 : i32
    scf.if %2 {
      %cst_14 = arith.constant 0.000000e+00 : f32
      %44 = vector.broadcast %cst_14 : f32 to vector<128x1xf32>
      %c0_15 = arith.constant 0 : index
      %c0_16 = arith.constant 0 : index
      %45 = vector.load %arg4[%c0_15, %c0_16] : memref<128x1xf32, #tpu.memory_space<vmem>>, vector<128x1xf32>
      tpu.vector_store %arg4[%c0_15, %c0_16], %44 {strides = array<i32>} : memref<128x1xf32, #tpu.memory_space<vmem>>, vector<128x1xf32>,
    } else {
    }
    %c0 = arith.constant 0 : index
    %c0_1 = arith.constant 0 : index
    %3 = vector.load %arg2[%c0, %c0_1] : memref<4x128xf32, #tpu.memory_space<vmem>>, vector<4x128xf32>
    %c0_2 = arith.constant 0 : index
    %c0_3 = arith.constant 0 : index
    %4 = vector.load %arg3[%c0_2, %c0_3] : memref<1x128xi32, #tpu.memory_space<vmem>>, vector<1x128xi32>
    %5 = tpu.iota {dimensions = array<i32: 0>} : vector<4x1xi32>
    %cst = arith.constant dense<0xFF800000> : vector<128xf32>
    %6 = vector.multi_reduction <maximumf>, %3, %cst [0] : vector<4x128xf32> to vector<128xf32>
    %7 = vector.shape_cast %6 : vector<128xf32> to vector<1x128xf32>
    %8 = vector.broadcast %7 : vector<1x128xf32> to vector<4x128xf32>
    %9 = arith.cmpf oge, %3, %8 : vector<4x128xf32>
    %c4_i32 = arith.constant 4 : i32
    %10 = vector.shape_cast %5 : vector<4x1xi32> to vector<4x1xi32>
    %11 = vector.broadcast %10 : vector<4x1xi32> to vector<4x128xi32>
    %12 = vector.broadcast %c4_i32 : i32 to vector<4x128xi32>
    %13 = arith.select %9, %11, %12 : vector<4x128xi1>, vector<4x128xi32>
    %cst_4 = arith.constant dense<2147483647> : vector<128xi32>
    %14 = vector.multi_reduction <minsi>, %13, %cst_4 [0] : vector<4x128xi32> to vector<128xi32>
    %15 = vector.shape_cast %14 : vector<128xi32> to vector<1x128xi32>
    %c1_i32 = arith.constant 1 : i32
    %16 = arith.muli %arg0, %c1_i32 : i32
    %17 = arith.addi %16, %arg1 : i32
    %c128_i32 = arith.constant 128 : i32
    %18 = arith.muli %17, %c128_i32 : i32
    %19 = tpu.iota {dimensions = array<i32: 1>} : vector<1x128xi32>
    %20 = vector.broadcast %18 : i32 to vector<1x128xi32>
    %21 = arith.addi %20, %19 : vector<1x128xi32>
    %c64_i32 = arith.constant 64 : i32
    %22 = vector.broadcast %c64_i32 : i32 to vector<1x128xi32>
    %23 = arith.cmpi slt, %21, %22 : vector<1x128xi32>
    %c4_i32_5 = arith.constant 4 : i32
    %24 = vector.broadcast %c4_i32_5 : i32 to vector<1x128xi32>
    %25 = arith.cmpi slt, %15, %24 : vector<1x128xi32>
    %26 = arith.andi %23, %25 : vector<1x128xi1>
    %c4_i32_6 = arith.constant 4 : i32
    %27 = vector.broadcast %c4_i32_6 : i32 to vector<1x128xi32>
    %28 = arith.muli %4, %27 : vector<1x128xi32>
    %29 = arith.addi %28, %15 : vector<1x128xi32>
    %c128_i32_7 = arith.constant 128 : i32
    %30 = vector.broadcast %c128_i32_7 : i32 to vector<1x128xi32>
    %31 = arith.select %26, %29, %30 : vector<1x128xi1>, vector<1x128xi32>
    %32 = tpu.iota {dimensions = array<i32: 0>} : vector<128x1xi32>
    %33 = vector.broadcast %31 : vector<1x128xi32> to vector<128x128xi32>
    %34 = vector.broadcast %32 : vector<128x1xi32> to vector<128x128xi32>
    %35 = arith.cmpi eq, %33, %34 : vector<128x128xi32>
    %36 = arith.extui %35 : vector<128x128xi1> to vector<128x128xi32>
    %37 = arith.sitofp %36 : vector<128x128xi32> to vector<128x128xf32>
    %38 = arith.truncf %37 : vector<128x128xf32> to vector<128x128xbf16>
    %cst_8 = arith.constant 1.000000e+00 : bf16
    %39 = vector.broadcast %cst_8 : bf16 to vector<128x1xbf16>
    %c0_9 = arith.constant 0 : index
    %c0_10 = arith.constant 0 : index
    %40 = vector.load %arg4[%c0_9, %c0_10] : memref<128x1xf32, #tpu.memory_space<vmem>>, vector<128x1xf32>
    %cst_11 = arith.constant dense<0.000000e+00> : vector<128x1xf32>
    %41 = tpu.matmul %38, %39, %cst_11 {dimension_numbers = #tpu.dot_dimension_numbers<[1], [0], [0], [1], [0, 0, 1, 1], [], []>} : vector<128x128xbf16>, vector<128x1xbf16>, vector<128x1xf32> -> vector<128x1xf32>
    %42 = arith.addf %40, %41 : vector<128x1xf32>
    %c0_12 = arith.constant 0 : index
    %c0_13 = arith.constant 0 : index
    %43 = vector.load %arg4[%c0_12, %c0_13] : memref<128x1xf32, #tpu.memory_space<vmem>>, vector<128x1xf32>
    tpu.vector_store %arg4[%c0_12, %c0_13], %42 {strides = array<i32>} : memref<128x1xf32, #tpu.memory_space<vmem>>, vector<128x1xf32>,
    return
  }
  func.func @transform_0(%arg0: i32, %arg1: i32) -> (i32, i32) {
    %c1_i32 = arith.constant 1 : i32
    %0 = arith.muli %arg0, %c1_i32 : i32
    %1 = arith.addi %0, %arg1 : i32
    %c0_i32 = arith.constant 0 : i32
    %2 = arith.minsi %1, %c0_i32 : i32
    %c0_i32_0 = arith.constant 0 : i32
    %c0_i32_1 = arith.constant 0 : i32
    return %c0_i32_0, %2 : i32, i32
  }
  func.func @transform_1(%arg0: i32, %arg1: i32) -> (i32, i32) {
    %c1_i32 = arith.constant 1 : i32
    %0 = arith.muli %arg0, %c1_i32 : i32
    %1 = arith.addi %0, %arg1 : i32
    %c0_i32 = arith.constant 0 : i32
    %2 = arith.minsi %1, %c0_i32 : i32
    %c0_i32_0 = arith.constant 0 : i32
    %c0_i32_1 = arith.constant 0 : i32
    return %c0_i32_0, %2 : i32, i32
  }
  func.func @transform_2(%arg0: i32, %arg1: i32) -> (i32, i32) {
    %c0_i32 = arith.constant 0 : i32
    %c0_i32_0 = arith.constant 0 : i32
    return %arg0, %c0_i32 : i32, i32
  }
}

</mosaic_0001>

<bundles_post_ra>
// kernel: run.1
= control target key start
LH: loop header
LB: loop body
LE: loop exit
PB: predicated region body
PF: predicated region fallthrough
CT: control target
= control target key end

     0   :  { %7 = vsyncpa [#allocation3], 0  ;;  %s1086_s0 = inlined_call_operand.hbm [shape: f32[4,64], index: 0, kind: input, shape index: {}]   ;;  %s1087_s1 = inlined_call_operand.vmem [shape: s32[1,64], index: 1, kind: input, shape index: {}]   ;;  %s1088_s2 = inlined_call_operand.vmem [shape: f32[256,1], index: 2, kind: output, shape index: {}]  }
   0x1   :  { %9 = vsyncpa [#allocation3 + $0x1], 0  ;;  %s854_s9 = smov 0   ;;  %s856_s10 = smov 0  }
   0x2   :  { %s858_s11 = smov 0   ;;  %s860_s12 = smov 0  }
   0x3   :  { %s862_s13 = smov 0  }
   0x4 LB: > { %s586_s14 = sadd.s32 4294967295, %s833_s13   ;;  %s27_s15 = sadd.s32 1, %s829_s12  ;;  %s833_s13 = sphi %s862_s13, %s15_s13   ;;  %s829_s12 = sphi %s860_s12, %s1099_s12   ;;  %s825_s11 = sphi %s858_s11, %s1098_s11   ;;  %s821_s10 = sphi %s856_s10, %s1076_s10   ;;  %s817_s9 = sphi %s854_s9, %s1097_s9  }
   0x5   : > { %p29_p0 = scmp.ge.s32.totalorder %s27_s15, 2  ;;  %p814_p1 = scmp.ne.s32.totalorder %s821_s10, 0 }
   0x6   : > { %p48_p2 = scmp.eq.s32.totalorder %s833_s13, 0  ;;  %p53_p3 = scmp.ne.s32.totalorder %s821_s10, %s817_s9 }
   0x7   : > { %s1101_s15 = smov (%p29_p0, %s27_s15), 0  ;;  %p54_p4 = scmp.eq.s32.totalorder %s586_s14, 0 }
   0x8   : > { %p49_p5 = por %p814_p1, %p48_p2  ;;  %p704_p7 = scmp.lt.s32.totalorder %s833_s13, 2 }
   0x9   : > { %p884_p6 = por %p54_p4, %p53_p3  ;;  %s835_s17 = smov [#allocation2]  }
   0xa   : > { %s149_s18 = sshll.u32 %s835_s17, 4  ;;  %p889_p8 = pnand %p704_p7, %p49_p5  ;;  %s150_s18 = int_to_ptr.vmem [resolvable:$true] %s149_s18 }
   0xb   : > { %s1091_s16 = scalar_select %p884_p6, 1, 0 }
   0xc   : > { %s1092_s19 = scalar_select %p889_p8, 1, 0 }
   0xd   : > { %s756_s22 = scalar_lea.hbm %s1086_s0, 64  ;;  %p758_p12 = pneg %p889_p8 }
   0xe   : > { %p757_p11 = scmp.ne.s32.totalorder %s1086_s0, %s756_s22  ;;  %p763_p1 = scmp.lt.u32.totalorder %s756_s22, %s756_s22 }
   0xf   : > { %p765_p2 = scmp.lt.u32.totalorder %s756_s22, %s1086_s0 }
  0x10   : > { %p759_p13 = pnand %p758_p12, %p757_p11 }
  0x11   : > { %p766_p3 = por %p765_p2, %p763_p1 }
  0x12   : > { %p760_p0 = pneg %p759_p13 }
  0x14   : > { %p767_p4 = pnand %p766_p3, %p760_p0 }
  0x16   : > { %770 = shalt.err (!%p767_p4)
}
  0x17   : > { %s771_s27 = scalar_lea.vmem %s150_s18, 64  ;;  %s778_s28 = scalar_lea.vmem %s150_s18, 128 }
  0x18   : > { %p772_p5 = scmp.ne.s32.totalorder %s150_s18, %s771_s27  ;;  %p779_p10 = scmp.lt.s32.totalorder %s150_s18, %s150_s18 }
  0x19   : > { %p780_p6 = scmp.lt.s32.totalorder %s778_s28, %s771_s27 }
  0x1a   : > { %p774_p7 = pnand %p772_p5, %p758_p12 }
  0x1b   : > { %p781_p8 = por %p780_p6, %p779_p10 }
  0x1c   : > { %p775_p9 = pneg %p774_p7 }
  0x1e   : > { %p782_p11 = pnand %p781_p8, %p775_p9 }
  0x20   : > { %785 = shalt.err (!%p782_p11)
}
  0x21   : > { %p1093_p13 = scmp.ne.s32.totalorder %s1092_s19, 0  ;;  %p1094_p0 = scmp.lt.s32.totalorder %s833_s13, 3 }
  0x22   : > { %p1095_p1 = scmp.ge.s32.totalorder %s833_s13, 1 }
  0x23   : > { %703 = dma.hbm_to_vmem [thread:$0]  (!%p1093_p13), %s1086_s0, 64, %s150_s18, [#allocation3]  }
  0x24   : > { %p167_p2 = pnand %p1095_p1, %p1094_p0 }
  0x25   : > { %s172_s3 = sand.u32 (!%p167_p2), 1, %s821_s10   ;;  %p1096_p6 = scmp.ne.s32.totalorder (!%p167_p2), %s1091_s16, 0 }
  0x26   : > { %170 = sbr.rel (%p167_p2) target bundleno = 312 (0x138), region = 28  ;;  %s593_s4 = sshll.u32 (!%p167_p2), %s172_s3, 2 }
  0x27   : > { %s173_s5 = scalar_lea.sflag (!%p167_p2), [#allocation3], %s172_s3  ;;  %s176_s6 = scalar_lea.vmem (!%p167_p2), [#allocation2], %s593_s4 }
  0x2d   : > { %811 = dma.done.wait (%p1096_p6), %s173_s5, 64  }
  0x2e   : > { %813 = vsyncadd (%p1096_p6), %s173_s5, 4294967232  ;;  %v836_v0 = vmov 1065369472   ;;  %s597_s7 = sshll.u32 %s825_s11, 4  ;;  %vm248_vm0 = vcmask 1043456   ;;  %vm227_vm1 = vcmask 7168   ;;  %v246_v7 = vlaneseq }
  0x2f   : > { %650 = vmatprep.subr.bf16.mxu0 %v836_v0  ;;  %682 = vmatprep.subr.bf16.mxu1 %v836_v0  ;;  %p216_p8 = scmp.lt.s32.totalorder %s597_s7, 31  ;;  %v244_v1 = vld [vmem:[%s176_s6] sm:$0xf]  ;;  %v837_v4 = vmov 0.0   ;;  %p207_p9 = scmp.lt.s32.totalorder %s825_s11, 0 }
  0x30   : > { %651 = vmatpush3.bf16.msra.mxu0 %v836_v0  ;;  %690 = vmatpush3.bf16.msra.mxu1 %v836_v0  ;;  %v249_v2 = vsel %vm248_vm0, %v244_v1, -inf  ;;  %v983_v10 = vshrl.u32 %v246_v7, 7  ;;  %s599_s18 = sshll.u32 %s825_s11, 7  ;;  %v271_v15 = vand.u32 127, %v246_v7  ;;  %v838_v40 = vmov 1.0|1.0  }
  0x31   : > { %652 = vmatprep.subr.bf16.mxu0 %v836_v0  ;;  %683 = vmatprep.subr.bf16.mxu1 %v836_v0  ;;  %s1103_s7 = smov (!%p216_p8, %s597_s7), 31  ;;  %v250_v3 = vrot.slane %v249_v2, 4  ;;  %v272_v17 = vstv %s599_s18 }
  0x32   : > { %s598_s8 = sshll.u32 %s1103_s7, 3  ;;  %v273_v20 = vadd.s32 %v272_v17, %v271_v15  ;;  %v297_v25 = vsub.s32 0, %v983_v10  ;;  %v280_v27 = vadd.s32 8, %v983_v10  ;;  %v287_v28 = vadd.s32 64, %v983_v10 }
  0x33   : > { %s935_s16 = scalar_lea.vmem %s1088_s2, %s598_s8  ;;  %v251_v5 = vmax.f32 %v249_v2, %v250_v3  ;;  %v288_v29 = vadd.s32 72, %v983_v10  ;;  %v281_v30 = vadd.s32 16, %v983_v10  ;;  %v282_v32 = vadd.s32 24, %v983_v10 }
  0x34   : > { %653 = vmatpush3.bf16.msra.mxu0 %v836_v0  ;;  %691 = vmatpush3.bf16.msra.mxu1 %v836_v0  ;;  %230 = vst.msk [vmem:[%s935_s16 + $0x10] sm:$0xff] %vm227_vm1, %v837_v4  ;;  %228 = vst.msk [vmem:[%s935_s16] sm:$0xff] %vm227_vm1, %v837_v4  ;;  %s208_s17 = scalar_select %p207_p9, %s825_s11, 0  ;;  %vm274_vm6 = vcmp.lt.s32.totalorder %v273_v20, 64  ;;  %v289_v33 = vadd.s32 80, %v983_v10  ;;  %v290_v34 = vadd.s32 88, %v983_v10 }
  0x35   : > { %654 = vmatprep.subr.bf16.mxu0 %v836_v0  ;;  %684 = vmatprep.subr.bf16.mxu1 %v836_v0  ;;  %229 = vst.msk [vmem:[%s935_s16 + $0x8] sm:$0xff] %vm227_vm1, %v837_v4  ;;  %231 = vst.msk [vmem:[%s935_s16 + $0x18] sm:$0xff] %vm227_vm1, %v837_v4  ;;  %v252_v6 = vrot.slane %v251_v5, 2  ;;  %v283_v36 = vadd.s32 32, %v983_v10  ;;  %v284_v37 = vadd.s32 40, %v983_v10  ;;  %v291_v38 = vadd.s32 96, %v983_v10 }
  0x36   : > { %232 = vst.msk [vmem:[%s935_s16 + $0x20] sm:$0xff] %vm227_vm1, %v837_v4  ;;  %233 = vst.msk [vmem:[%s935_s16 + $0x28] sm:$0xff] %vm227_vm1, %v837_v4  ;;  %s1105_s17 = smov (!%p207_p9, %s208_s17), 0  ;;  %v292_v39 = vadd.s32 104, %v983_v10  ;;  %v285_v41 = vadd.s32 48, %v983_v10  ;;  %v286_v42 = vadd.s32 56, %v983_v10 }
  0x37   : > { %234 = vst.msk [vmem:[%s935_s16 + $0x30] sm:$0xff] %vm227_vm1, %v837_v4  ;;  %235 = vst.msk [vmem:[%s935_s16 + $0x38] sm:$0xff] %vm227_vm1, %v837_v4  ;;  %v253_v8 = vmax.f32 %v251_v5, %v252_v6  ;;  %s211_s21 = scalar_lea.vmem %s1087_s1, %s1105_s17  ;;  %v293_v43 = vadd.s32 112, %v983_v10  ;;  %v294_v44 = vadd.s32 120, %v983_v10 }
  0x38   : > { %655 = vmatpush3.bf16.msra.mxu0 %v836_v0  ;;  %692 = vmatpush3.bf16.msra.mxu1 %v836_v0  ;;  %236 = vst.msk [vmem:[%s935_s16 + $0x40] sm:$0xff] %vm227_vm1, %v837_v4  ;;  %237 = vst.msk [vmem:[%s935_s16 + $0x48] sm:$0xff] %vm227_vm1, %v837_v4  ;;  %v245_v19 = vld [vmem:[%s211_s21] sm:$0x1] }
  0x39   : > { %238 = vst.msk [vmem:[%s935_s16 + $0x50] sm:$0xff] %vm227_vm1, %v837_v4  ;;  %239 = vst.msk [vmem:[%s935_s16 + $0x58] sm:$0xff] %vm227_vm1, %v837_v4  ;;  %656 = vmatprep.subr.bf16.mxu0 %v836_v0  ;;  %685 = vmatprep.subr.bf16.mxu1 %v836_v0  ;;  %v254_v9 = vrot.slane %v253_v8, 1  ;;  %v277_v23 = vmul.u32 4, %v245_v19 }
  0x3a   : > { %240 = vst.msk [vmem:[%s935_s16 + $0x60] sm:$0xff] %vm227_vm1, %v837_v4  ;;  %241 = vst.msk [vmem:[%s935_s16 + $0x68] sm:$0xff] %vm227_vm1, %v837_v4 }
  0x3b   : > { %242 = vst.msk [vmem:[%s935_s16 + $0x70] sm:$0xff] %vm227_vm1, %v837_v4  ;;  %243 = vst.msk [vmem:[%s935_s16 + $0x78] sm:$0xff] %vm227_vm1, %v837_v4  ;;  %v255_v11 = vmax.f32 %v253_v8, %v254_v9  ;;  %v357_v45 = vld [vmem:[%s935_s16 + $0x10] sm:$0xff]  ;;  %v355_v47 = vld [vmem:[%s935_s16] sm:$0xff] }
  0x3c   : > { %657 = vmatpush3.bf16.msra.mxu0 %v836_v0  ;;  %693 = vmatpush3.bf16.msra.mxu1 %v836_v0  ;;  %v358_v50 = vld [vmem:[%s935_s16 + $0x18] sm:$0xff]  ;;  %v356_v55 = vld [vmem:[%s935_s16 + $0x8] sm:$0xff] }
  0x3d   : > { %658 = vmatprep.subr.bf16.mxu0 %v836_v0  ;;  %686 = vmatprep.subr.bf16.mxu1 %v836_v0  ;;  %vm256_vm2 = vcmp.ge.f32.partialorder %v244_v1, %v255_v11  ;;  %v359_v7 = vld [vmem:[%s935_s16 + $0x20] sm:$0xff]  ;;  %v360_v15 = vld [vmem:[%s935_s16 + $0x28] sm:$0xff] }
  0x3e   : > { %v257_v12 = vsel %vm256_vm2, %v983_v10, 4  ;;  %v361_v5 = vld [vmem:[%s935_s16 + $0x30] sm:$0xff] }
  0x3f   : > { %v258_v13 = vsel %vm248_vm0, %v257_v12, 2147483647  ;;  %v363_v49 = vld [vmem:[%s935_s16 + $0x40] sm:$0xff]  ;;  %v364_v60 = vld [vmem:[%s935_s16 + $0x48] sm:$0xff] }
  0x40   : > { %659 = vmatpush3.bf16.msra.mxu0 %v836_v0  ;;  %694 = vmatpush3.bf16.msra.mxu1 %v836_v0  ;;  %v259_v14 = vrot.slane %v258_v13, 4  ;;  %v365_v46 = vld [vmem:[%s935_s16 + $0x50] sm:$0xff]  ;;  %v366_v54 = vld [vmem:[%s935_s16 + $0x58] sm:$0xff] }
  0x41   : > { %660 = vmatprep.subr.bf16.mxu0 %v836_v0  ;;  %687 = vmatprep.subr.bf16.mxu1 %v836_v0  ;;  %v367_v9 = vld [vmem:[%s935_s16 + $0x60] sm:$0xff]  ;;  %v368_v20 = vld [vmem:[%s935_s16 + $0x68] sm:$0xff] }
  0x42   : > { %vm260_vm3 = vcmp.lt.s32.totalorder %v258_v13, %v259_v14  ;;  %v369_v6 = vld [vmem:[%s935_s16 + $0x70] sm:$0xff] }
  0x43   : > { %v261_v16 = vsel %vm260_vm3, %v258_v13, %v259_v14  ;;  %v370_v14 = vld [vmem:[%s935_s16 + $0x78] sm:$0xff] }
  0x44   : > { %661 = vmatpush3.bf16.msra.mxu0 %v836_v0  ;;  %695 = vmatpush3.bf16.msra.mxu1 %v836_v0  ;;  %v262_v18 = vrot.slane %v261_v16, 2 }
  0x45   : > { %662 = vmatprep.subr.bf16.mxu0 %v836_v0  ;;  %688 = vmatprep.subr.bf16.mxu1 %v836_v0 }
  0x46   : > { %vm263_vm4 = vcmp.lt.s32.totalorder %v261_v16, %v262_v18 }
  0x47   : > { %v264_v21 = vsel %vm263_vm4, %v261_v16, %v262_v18 }
  0x48   : > { %663 = vmatpush3.bf16.msra.mxu0 %v836_v0  ;;  %696 = vmatpush3.bf16.msra.mxu1 %v836_v0  ;;  %v265_v22 = vrot.slane %v264_v21, 1 }
  0x49   : > { %664 = vmatprep.subr.bf16.mxu0 %v836_v0  ;;  %689 = vmatprep.subr.bf16.mxu1 %v836_v0 }
  0x4a   : > { %vm266_vm5 = vcmp.lt.s32.totalorder %v264_v21, %v265_v22 }
  0x4b   : > { %v267_v24 = vsel %vm266_vm5, %v264_v21, %v265_v22 }
  0x4c   : > { %665 = vmatpush3.bf16.msra.mxu0 %v836_v0  ;;  %697 = vmatpush3.bf16.msra.mxu1 %v836_v0  ;;  %vm275_vm7 = vcmp.lt.s32.totalorder %v267_v24, 4  ;;  %v278_v26 = vadd.s32 %v277_v23, %v267_v24 }
  0x4d   : > { %vm276_vm8 = vmand %vm274_vm6, %vm275_vm7 }
  0x4e   : > { %v279_v31 = vsel %vm276_vm8, %v278_v26, 128 }
  0x4f   : > { %v298_v35 = vrot.slane %v279_v31, %v297_v25 }
  0x51   : > { %vm299_vm9 = vcmp.eq.s32.totalorder %v298_v35, %v983_v10  ;;  %vm300_vm10 = vcmp.eq.s32.totalorder %v298_v35, %v280_v27  ;;  %vm307_vm11 = vcmp.eq.s32.totalorder %v298_v35, %v287_v28  ;;  %vm308_vm12 = vcmp.eq.s32.totalorder %v298_v35, %v288_v29  ;;  %v362_v10 = vld [vmem:[%s935_s16 + $0x38] sm:$0xff] }
  0x52   : > { %vm616_vm13 = vmpackc.low %vm300_vm10, %vm299_vm9  ;;  %vm301_vm14 = vcmp.eq.s32.totalorder %v298_v35, %v281_v30  ;;  %vm302_vm15 = vcmp.eq.s32.totalorder %v298_v35, %v282_v32  ;;  %vm309_vm0 = vcmp.eq.s32.totalorder %v298_v35, %v289_v33  ;;  %vm310_vm2 = vcmp.eq.s32.totalorder %v298_v35, %v290_v34 }
  0x53   : > { %666 = vmatprep.mubr.msk.bf16.mxu0 %vm616_vm13, %v838_v40  ;;  %vm624_vm3 = vmpackc.low %vm308_vm12, %vm307_vm11  ;;  %vm303_vm4 = vcmp.eq.s32.totalorder %v298_v35, %v283_v36  ;;  %vm304_vm5 = vcmp.eq.s32.totalorder %v298_v35, %v284_v37  ;;  %vm311_vm7 = vcmp.eq.s32.totalorder %v298_v35, %v291_v38  ;;  %vm312_vm8 = vcmp.eq.s32.totalorder %v298_v35, %v292_v39 }
  0x54   : > { %674 = vmatprep.mubr.msk.bf16.mxu1 %vm624_vm3, %v838_v40  ;;  %vm618_vm6 = vmpackc.low %vm302_vm15, %vm301_vm14  ;;  %vm305_vm12 = vcmp.eq.s32.totalorder %v298_v35, %v285_v41  ;;  %vm306_vm13 = vcmp.eq.s32.totalorder %v298_v35, %v286_v42  ;;  %vm313_vm14 = vcmp.eq.s32.totalorder %v298_v35, %v293_v43  ;;  %vm314_vm15 = vcmp.eq.s32.totalorder %v298_v35, %v294_v44 }
  0x55   : > { %667 = vmatmul.mubr.msk.bf16.vlgmr.msra.gmra.mrb[0].mxu0 %vm618_vm6, %v838_v40  ;;  %vm626_vm9 = vmpackc.low %vm310_vm2, %vm309_vm0 }
  0x56   : > { %675 = vmatmul.mubr.msk.bf16.vlgmr.msra.gmra.mrb[0].mxu1 %vm626_vm9, %v838_v40  ;;  %vm620_vm10 = vmpackc.low %vm304_vm5, %vm303_vm4 }
  0x57   : > { %670 = vmatprep.mubr.msk.bf16.mxu0 %vm620_vm10, %v838_v40  ;;  %vm628_vm11 = vmpackc.low %vm312_vm8, %vm311_vm7 }
  0x58   : > { %678 = vmatprep.mubr.msk.bf16.mxu1 %vm628_vm11, %v838_v40  ;;  %vm622_vm3 = vmpackc.low %vm306_vm13, %vm305_vm12 }
  0x59   : > { %vm630_vm6 = vmpackc.low %vm314_vm15, %vm313_vm14 }
  0x5d   : > { %671 = vmatmul.mubr.msk.bf16.gmra.mrb[4].mxu0 %vm622_vm3, %v838_v40 }
  0x5e   : > { %679 = vmatmul.mubr.msk.bf16.gmra.mrb[4].mxu1 %vm630_vm6, %v838_v40 }
 0x128   : > { %v668_v48 = vpop.f32.mrb[0].mxu0 }
 0x129   : > { %v470_v51 = vadd.f32 %v668_v48, %v357_v45  ;;  %v676_v52 = vpop.f32.mrb[0].mxu1  ;;  %v405_v53 = vpop.f32.mrb[1].mxu0 }
 0x12a   : > { %v478_v56 = vadd.f32 %v676_v52, %v365_v46  ;;  %v468_v57 = vadd.f32 %v405_v53, %v355_v47  ;;  %v437_v58 = vpop.f32.mrb[1].mxu1  ;;  %v669_v59 = vpop.f32.mrb[2].mxu0 }
 0x12b   : > { %487 = vst.msk [vmem:[%s935_s16 + $0x10] sm:$0xff] %vm227_vm1, %v470_v51  ;;  %v476_v61 = vadd.f32 %v437_v58, %v363_v49  ;;  %v471_v62 = vadd.f32 %v669_v59, %v358_v50  ;;  %v677_v63 = vpop.f32.mrb[2].mxu1  ;;  %v408_v0 = vpop.f32.mrb[3].mxu0 }
 0x12c   : > { %495 = vst.msk [vmem:[%s935_s16 + $0x50] sm:$0xff] %vm227_vm1, %v478_v56  ;;  %485 = vst.msk [vmem:[%s935_s16] sm:$0xff] %vm227_vm1, %v468_v57  ;;  %v479_v1 = vadd.f32 %v677_v63, %v366_v54  ;;  %v469_v2 = vadd.f32 %v408_v0, %v356_v55  ;;  %v440_v3 = vpop.f32.mrb[3].mxu1 }
 0x12d   : > { %493 = vst.msk [vmem:[%s935_s16 + $0x40] sm:$0xff] %vm227_vm1, %v476_v61  ;;  %488 = vst.msk [vmem:[%s935_s16 + $0x18] sm:$0xff] %vm227_vm1, %v471_v62  ;;  %v477_v4 = vadd.f32 %v440_v3, %v364_v60 }
 0x12e   : > { %496 = vst.msk [vmem:[%s935_s16 + $0x58] sm:$0xff] %vm227_vm1, %v479_v1  ;;  %486 = vst.msk [vmem:[%s935_s16 + $0x8] sm:$0xff] %vm227_vm1, %v469_v2 }
 0x12f   : > { %494 = vst.msk [vmem:[%s935_s16 + $0x48] sm:$0xff] %vm227_vm1, %v477_v4 }
 0x130   : > { %v672_v8 = vpop.f32.mrb[4].mxu0 }
 0x131   : > { %v474_v11 = vadd.f32 %v672_v8, %v361_v5  ;;  %v680_v12 = vpop.f32.mrb[4].mxu1  ;;  %v421_v13 = vpop.f32.mrb[5].mxu0 }
 0x132   : > { %v482_v16 = vadd.f32 %v680_v12, %v369_v6  ;;  %v472_v17 = vadd.f32 %v421_v13, %v359_v7  ;;  %v453_v18 = vpop.f32.mrb[5].mxu1  ;;  %v673_v19 = vpop.f32.mrb[6].mxu0 }
 0x133   : > { %491 = vst.msk [vmem:[%s935_s16 + $0x30] sm:$0xff] %vm227_vm1, %v474_v11  ;;  %v480_v21 = vadd.f32 %v453_v18, %v367_v9  ;;  %v475_v22 = vadd.f32 %v673_v19, %v362_v10  ;;  %v681_v23 = vpop.f32.mrb[6].mxu1  ;;  %v424_v24 = vpop.f32.mrb[7].mxu0 }
 0x134   : > { %499 = vst.msk [vmem:[%s935_s16 + $0x70] sm:$0xff] %vm227_vm1, %v482_v16  ;;  %489 = vst.msk [vmem:[%s935_s16 + $0x20] sm:$0xff] %vm227_vm1, %v472_v17  ;;  %v483_v25 = vadd.f32 %v681_v23, %v370_v14  ;;  %v473_v26 = vadd.f32 %v424_v24, %v360_v15  ;;  %v456_v27 = vpop.f32.mrb[7].mxu1 }
 0x135   : > { %497 = vst.msk [vmem:[%s935_s16 + $0x60] sm:$0xff] %vm227_vm1, %v480_v21  ;;  %492 = vst.msk [vmem:[%s935_s16 + $0x38] sm:$0xff] %vm227_vm1, %v475_v22  ;;  %v481_v28 = vadd.f32 %v456_v27, %v368_v20 }
 0x136   : > { %500 = vst.msk [vmem:[%s935_s16 + $0x78] sm:$0xff] %vm227_vm1, %v483_v25  ;;  %490 = vst.msk [vmem:[%s935_s16 + $0x28] sm:$0xff] %vm227_vm1, %v473_v26 }
 0x137   : > { %498 = vst.msk [vmem:[%s935_s16 + $0x68] sm:$0xff] %vm227_vm1, %v481_v28 }
 0x138 PF: > { %s15_s13 = sadd.s32 1, %s833_s13   ;;  %s1097_s9 = smov %s821_s10 }
 0x139   : > { %p12_p10 = scmp.ge.s32.totalorder %s15_s13, 4   ;;  %s1076_s10 = smov 0  }
 0x13a   : > { %s1098_s11 = smov %s829_s12  ;;  %s1099_s12 = smov %s1101_s15 }
 0x13b   :  { %14 = sbr.rel (!%p12_p10) target bundleno = 4 (0x4), region = 75 }
 0x142   :  { %523 = vsyncpa [#allocation3], 1 }
 0x143   :  { %525 = vsyncpa [#allocation3 + $0x1], 1 }

</bundles_post_ra>
